<compile_context>
chip_gen: v7x
topology: tpu7x:2x2x1
jax: 0.10.0
libtpu: 0.0.40
codegen_flags: <defaults>
</compile_context>

<pallas_src>
import math
import functools

import jax
import jax.numpy as jnp
from jax.experimental import pallas as pl
from jax.experimental.pallas import tpu as pltpu


# ---------------------------------------------------------------------------
# Helpers
# ---------------------------------------------------------------------------
def _round_up(x, m):
    return ((x + m - 1) // m) * m


def sinusoidal_table(n, d_model):
    """FixedEmbedding weight: w[i, 0::2]=sin(i*div), w[i, 1::2]=cos(i*div)."""
    position = jnp.arange(n, dtype=jnp.float32)[:, None]
    div_term = jnp.exp(
        jnp.arange(0, d_model, 2, dtype=jnp.float32) * -(math.log(10000.0) / d_model)
    )
    tab = jnp.zeros((n, d_model), jnp.float32)
    tab = tab.at[:, 0::2].set(jnp.sin(position * div_term))
    tab = tab.at[:, 1::2].set(jnp.cos(position * div_term))
    return tab


def _vmem_limit_bytes(tile, n_marks, c_pad, d_model, n_splits):
    """Right-size the scoped-VMEM request: double-buffered in/out blocks + tables + slack."""
    in_blk = tile * _round_up(n_marks, 128) * 4          # int32, lanes padded to 128
    out_blk = tile * _round_up(d_model, 128) * 4         # f32 output block
    tables = n_splits * c_pad * _round_up(d_model, 128) * 2  # bf16 table splits
    need = 2 * (in_blk + out_blk + tables) + (4 << 20)   # 2x buffers + compiler slack
    return int(min(max(need, 8 << 20), 100 << 20))


# ---------------------------------------------------------------------------
# Kernel
# ---------------------------------------------------------------------------
def _temporal_embed_kernel(x_ref, tab_ref, o_ref, *, field_spec):
    """Fused multi-table FixedEmbedding lookup + sum.

    x_ref     : (tile_rows, n_marks) int32      time-feature indices
    tab_ref   : (n_splits, C_pad, D) bfloat16   bf16 hi/mid/lo splits of the f32 table
    o_ref     : (tile_rows, D) out dtype
    field_spec: static tuple of (column_in_x, row_offset_in_table)
    """
    idx = x_ref[...].astype(jnp.int32)                       # (rows, n_marks)
    rows = idx.shape[0]
    n_splits, c_pad, _ = tab_ref.shape

    # Multi-hot selector: OR of per-field (lane_iota == index + offset) masks (bool VPU work),
    # single cast to bf16 at the end.  Valid field ranges are disjoint, so OR == the sum of
    # one-hot selectors the PyTorch forward implies.
    col = jax.lax.broadcasted_iota(jnp.int32, (rows, c_pad), 1)
    sel = None
    for f_col, off in field_spec:                            # static unroll (<=5 fields)
        target = idx[:, f_col:f_col + 1] + off               # (rows, 1) -> lane broadcast
        hit = col == target
        sel = hit if sel is None else jnp.logical_or(sel, hit)
    mh = sel.astype(jnp.bfloat16)                            # exact 0/1 in bf16

    # Native bf16 MXU passes with f32 accumulation replace the emulated f32 matmul.
    acc = jnp.dot(mh, tab_ref[0], preferred_element_type=jnp.float32)
    for s in range(1, n_splits):                             # static unroll (n_splits is static)
        acc = acc + jnp.dot(mh, tab_ref[s], preferred_element_type=jnp.float32)
    o_ref[...] = acc.astype(o_ref.dtype)


# ---------------------------------------------------------------------------
# Wrapper
# ---------------------------------------------------------------------------
def temporal_embedding_pallas(x_flat, table_splits, field_spec, *,
                              tile_rows=2048, out_dtype=jnp.float32):
    """x_flat: (R, n_marks) int32, table_splits: (S, C_pad, D) bf16 -> (R, D) out_dtype."""
    R, n_marks = x_flat.shape
    n_splits, c_pad, d_model = table_splits.shape

    # Row tile: large (amortize ~0.35us/grid-step), sublane aligned, and >=2 grid steps when
    # possible so both v7x TensorCores get work under dimension_semantics=("parallel",).
    tile = min(int(tile_rows), _round_up(R, 8))
    tile = max(8, _round_up(tile, 8))
    if R > 8 and pl.cdiv(R, tile) < 2:
        tile = max(8, _round_up(pl.cdiv(R, 2), 8))
    grid = pl.cdiv(R, tile)

    kernel = functools.partial(_temporal_embed_kernel, field_spec=tuple(field_spec))
    # True (R, D) out_shape with a ragged last block: no pad-concat and no post-kernel slice.
    return pl.pallas_call(
        kernel,
        out_shape=jax.ShapeDtypeStruct((R, d_model), out_dtype),
        grid_spec=pltpu.PrefetchScalarGridSpec(
            num_scalar_prefetch=0,
            grid=(grid,),
            in_specs=[
                # TODO(synk): the int32 (tile, n_marks) block lane-pads n_marks to 128 in VMEM;
                # an (n_marks, R) transposed / int8-packed layout would shave 1-4 MiB of VMEM.
                pl.BlockSpec((tile, n_marks), lambda i: (i, 0)),
                # constant block index -> table splits stay resident in VMEM across the grid
                pl.BlockSpec((n_splits, c_pad, d_model), lambda i: (0, 0, 0)),
            ],
            out_specs=pl.BlockSpec((tile, d_model), lambda i: (i, 0)),
        ),
        compiler_params=pltpu.CompilerParams(
            dimension_semantics=("parallel",),
            vmem_limit_bytes=_vmem_limit_bytes(tile, n_marks, c_pad, d_model, n_splits),
        ),
    )(x_flat, table_splits)


class TemporalEmbeddingPallas:
    """JAX/Pallas port of TemporalEmbedding (embed_type='fixed')."""

    def __init__(self, d_model, embed_type="fixed", freq="h", num_table_splits=3):
        # TODO(synk): embed_type != 'fixed' (learned nn.Embedding) needs trained weights; only
        # the fixed sinusoidal path is implemented here.
        assert embed_type == "fixed"
        # (name, table_size, column_in_x) — matches the PyTorch forward's column usage.
        fields = [("hour", 24, 3), ("weekday", 7, 2), ("day", 32, 1), ("month", 13, 0)]
        if freq in ("t", "10min"):
            fields.append(("minute", 6, 4))

        tabs, spec, off = [], [], 0
        for _, size, col in fields:
            tabs.append(sinusoidal_table(size, d_model))
            spec.append((col, off))
            off += size
        table = jnp.concatenate(tabs, axis=0)                 # (sum sizes, D), f32
        c_pad = _round_up(off, 128)                           # keep contraction at exactly 128
        if c_pad != off:
            table = jnp.concatenate(
                [table, jnp.zeros((c_pad - off, d_model), jnp.float32)], axis=0
            )

        # bf16 hi/mid/lo split of the f32 table: the multi-hot entries are exact 0/1, so the
        # only error is the split residual (~1e-7 for 3 terms) — well inside the 1e-5 check.
        splits, resid = [], table
        for _ in range(num_table_splits):
            h = resid.astype(jnp.bfloat16)
            splits.append(h)
            resid = resid - h.astype(jnp.float32)
        self.table_splits = jnp.stack(splits, axis=0)          # (S, C_pad, D) bf16, VMEM-resident
        self.field_spec = tuple(spec)
        self.d_model = d_model
        self.n_marks_needed = max(c for c, _ in spec) + 1

    def __call__(self, x_mark, *, tile_rows=2048, out_dtype=jnp.float32):
        """x_mark: (B, L, n_marks) int/float time features -> (B, L, d_model)."""
        B, L, n_marks = x_mark.shape
        assert n_marks >= self.n_marks_needed
        x_flat = x_mark.astype(jnp.int32).reshape(B * L, n_marks)   # x.long()
        out = temporal_embedding_pallas(
            x_flat, self.table_splits, self.field_spec,
            tile_rows=tile_rows, out_dtype=out_dtype,
        )
        return out.reshape(B, L, self.d_model)


# ---------------------------------------------------------------------------
if __name__ == "__main__":
    key = jax.random.PRNGKey(0)
    B, L, d_model = 2, 24, 128        # lane-dense output (D multiple of 128)

    k0, k1, k2, k3, k4 = jax.random.split(key, 5)
    x_mark = jnp.stack(
        [
            jax.random.randint(k0, (B, L), 0, 13),   # month   -> column 0
            jax.random.randint(k1, (B, L), 0, 32),   # day     -> column 1
            jax.random.randint(k2, (B, L), 0, 7),    # weekday -> column 2
            jax.random.randint(k3, (B, L), 0, 24),   # hour    -> column 3
            jax.random.randint(k4, (B, L), 0, 6),    # minute  -> column 4 (used when freq='t')
        ],
        axis=-1,
    ).astype(jnp.int32)

    # Pure-JAX reference tables (exactly the PyTorch FixedEmbedding weights).
    hour_t = sinusoidal_table(24, d_model)
    weekday_t = sinusoidal_table(7, d_model)
    day_t = sinusoidal_table(32, d_model)
    month_t = sinusoidal_table(13, d_model)
    minute_t = sinusoidal_table(6, d_model)

    # freq='h' (4 fields)
    model_h = TemporalEmbeddingPallas(d_model, embed_type="fixed", freq="h")
    out_h = model_h(x_mark, tile_rows=2048)
    jax.block_until_ready(out_h)
    assert out_h.shape == (B, L, d_model)
    ref_h = (
        hour_t[x_mark[..., 3]]
        + weekday_t[x_mark[..., 2]]
        + day_t[x_mark[..., 1]]
        + month_t[x_mark[..., 0]]
    )
    assert jnp.allclose(out_h, ref_h, atol=1e-5), float(jnp.max(jnp.abs(out_h - ref_h)))

    # freq='t' (5 fields incl. minute)
    model_t = TemporalEmbeddingPallas(d_model, embed_type="fixed", freq="t")
    out_t = model_t(x_mark, tile_rows=2048)
    jax.block_until_ready(out_t)
    ref_t = ref_h + minute_t[x_mark[..., 4]]
    assert jnp.allclose(out_t, ref_t, atol=1e-5), float(jnp.max(jnp.abs(out_t - ref_t)))

    print("KERNEL_OK")
</pallas_src>

<mosaic_0001>
module attributes {stable_mosaic.version = 11 : i64} {
  func.func @_temporal_embed_kernel(%arg0: i32, %arg1: memref<24x5xi32, #tpu.memory_space<vmem>>, %arg2: memref<3x128x128xbf16, #tpu.memory_space<vmem>>, %arg3: memref<24x128xf32, #tpu.memory_space<vmem>>) attributes {dimension_semantics = [#tpu.dimension_semantics<parallel>], iteration_bounds = array<i64: 2>, scalar_prefetch = 0 : i64, scratch_operands = 0 : i64, tpu.core_type = #tpu.core_type<tc>, window_params = [{transform_indices = @transform_0, window_bounds = array<i64: 24, 5>}, {pipeline_mode = #tpu.pipeline_mode<synchronous>, transform_indices = @transform_1, window_bounds = array<i64: 3, 128, 128>}, {transform_indices = @transform_2, window_bounds = array<i64: 24, 128>}]} {
    %c0 = arith.constant 0 : index
    %c0_0 = arith.constant 0 : index
    %0 = vector.load %arg1[%c0, %c0_0] : memref<24x5xi32, #tpu.memory_space<vmem>>, vector<24x5xi32>
    %1 = tpu.iota {dimensions = array<i32: 1>} : vector<24x128xi32>
    %2 = vector.extract_strided_slice %0 {offsets = [0, 3], sizes = [24, 1], strides = [1, 1]} : vector<24x5xi32> to vector<24x1xi32>
    %c0_i32 = arith.constant 0 : i32
    %3 = vector.broadcast %c0_i32 : i32 to vector<24x1xi32>
    %4 = arith.addi %2, %3 : vector<24x1xi32>
    %5 = vector.broadcast %4 : vector<24x1xi32> to vector<24x128xi32>
    %6 = arith.cmpi eq, %1, %5 : vector<24x128xi32>
    %7 = vector.extract_strided_slice %0 {offsets = [0, 2], sizes = [24, 1], strides = [1, 1]} : vector<24x5xi32> to vector<24x1xi32>
    %c24_i32 = arith.constant 24 : i32
    %8 = vector.broadcast %c24_i32 : i32 to vector<24x1xi32>
    %9 = arith.addi %7, %8 : vector<24x1xi32>
    %10 = vector.broadcast %9 : vector<24x1xi32> to vector<24x128xi32>
    %11 = arith.cmpi eq, %1, %10 : vector<24x128xi32>
    %12 = arith.ori %6, %11 : vector<24x128xi1>
    %13 = vector.extract_strided_slice %0 {offsets = [0, 1], sizes = [24, 1], strides = [1, 1]} : vector<24x5xi32> to vector<24x1xi32>
    %c31_i32 = arith.constant 31 : i32
    %14 = vector.broadcast %c31_i32 : i32 to vector<24x1xi32>
    %15 = arith.addi %13, %14 : vector<24x1xi32>
    %16 = vector.broadcast %15 : vector<24x1xi32> to vector<24x128xi32>
    %17 = arith.cmpi eq, %1, %16 : vector<24x128xi32>
    %18 = arith.ori %12, %17 : vector<24x128xi1>
    %19 = vector.extract_strided_slice %0 {offsets = [0, 0], sizes = [24, 1], strides = [1, 1]} : vector<24x5xi32> to vector<24x1xi32>
    %c63_i32 = arith.constant 63 : i32
    %20 = vector.broadcast %c63_i32 : i32 to vector<24x1xi32>
    %21 = arith.addi %19, %20 : vector<24x1xi32>
    %22 = vector.broadcast %21 : vector<24x1xi32> to vector<24x128xi32>
    %23 = arith.cmpi eq, %1, %22 : vector<24x128xi32>
    %24 = arith.ori %18, %23 : vector<24x128xi1>
    %25 = arith.extui %24 : vector<24x128xi1> to vector<24x128xi32>
    %26 = arith.sitofp %25 : vector<24x128xi32> to vector<24x128xf32>
    %27 = arith.truncf %26 : vector<24x128xf32> to vector<24x128xbf16>
    %c0_1 = arith.constant 0 : index
    %c0_2 = arith.constant 0 : index
    %c0_3 = arith.constant 0 : index
    %28 = vector.load %arg2[%c0_1, %c0_2, %c0_3] : memref<3x128x128xbf16, #tpu.memory_space<vmem>>, vector<1x128x128xbf16>
    %29 = vector.shape_cast %28 : vector<1x128x128xbf16> to vector<128x128xbf16>
    %cst = arith.constant dense<0.000000e+00> : vector<24x128xf32>
    %30 = tpu.matmul %27, %29, %cst {dimension_numbers = #tpu.dot_dimension_numbers<[1], [0], [0], [1], [0, 0, 1, 1], [], []>} : vector<24x128xbf16>, vector<128x128xbf16>, vector<24x128xf32> -> vector<24x128xf32>
    %c1 = arith.constant 1 : index
    %c0_4 = arith.constant 0 : index
    %c0_5 = arith.constant 0 : index
    %31 = vector.load %arg2[%c1, %c0_4, %c0_5] : memref<3x128x128xbf16, #tpu.memory_space<vmem>>, vector<1x128x128xbf16>
    %32 = vector.shape_cast %31 : vector<1x128x128xbf16> to vector<128x128xbf16>
    %cst_6 = arith.constant dense<0.000000e+00> : vector<24x128xf32>
    %33 = tpu.matmul %27, %32, %cst_6 {dimension_numbers = #tpu.dot_dimension_numbers<[1], [0], [0], [1], [0, 0, 1, 1], [], []>} : vector<24x128xbf16>, vector<128x128xbf16>, vector<24x128xf32> -> vector<24x128xf32>
    %34 = arith.addf %30, %33 : vector<24x128xf32>
    %c2 = arith.constant 2 : index
    %c0_7 = arith.constant 0 : index
    %c0_8 = arith.constant 0 : index
    %35 = vector.load %arg2[%c2, %c0_7, %c0_8] : memref<3x128x128xbf16, #tpu.memory_space<vmem>>, vector<1x128x128xbf16>
    %36 = vector.shape_cast %35 : vector<1x128x128xbf16> to vector<128x128xbf16>
    %cst_9 = arith.constant dense<0.000000e+00> : vector<24x128xf32>
    %37 = tpu.matmul %27, %36, %cst_9 {dimension_numbers = #tpu.dot_dimension_numbers<[1], [0], [0], [1], [0, 0, 1, 1], [], []>} : vector<24x128xbf16>, vector<128x128xbf16>, vector<24x128xf32> -> vector<24x128xf32>
    %38 = arith.addf %34, %37 : vector<24x128xf32>
    %c0_10 = arith.constant 0 : index
    %c0_11 = arith.constant 0 : index
    %39 = vector.load %arg3[%c0_10, %c0_11] : memref<24x128xf32, #tpu.memory_space<vmem>>, vector<24x128xf32>
    tpu.vector_store %arg3[%c0_10, %c0_11], %38 {strides = array<i32>} : memref<24x128xf32, #tpu.memory_space<vmem>>, vector<24x128xf32>,
    return
  }
  func.func @transform_0(%arg0: i32) -> (i32, i32) {
    %c0_i32 = arith.constant 0 : i32
    %c0_i32_0 = arith.constant 0 : i32
    return %arg0, %c0_i32 : i32, i32
  }
  func.func @transform_1(%arg0: i32) -> (i32, i32, i32) {
    %c0_i32 = arith.constant 0 : i32
    %c0_i32_0 = arith.constant 0 : i32
    %c0_i32_1 = arith.constant 0 : i32
    %c0_i32_2 = arith.constant 0 : i32
    return %c0_i32, %c0_i32_0, %c0_i32_1 : i32, i32, i32
  }
  func.func @transform_2(%arg0: i32) -> (i32, i32) {
    %c0_i32 = arith.constant 0 : i32
    %c0_i32_0 = arith.constant 0 : i32
    return %arg0, %c0_i32 : i32, i32
  }
}

</mosaic_0001>

<bundles_post_ra>
// kernel: tpu_custom_call.1
= control target key start
LH: loop header
LB: loop body
LE: loop exit
PB: predicated region body
PF: predicated region fallthrough
CT: control target
= control target key end

     0   :  { %7 = vsyncpa [#allocation3], 0  ;;  %s1178_s0 = inlined_call_operand.vmem [shape: s32[48,5], index: 0, kind: input, shape index: {}]   ;;  %s1179_s1 = inlined_call_operand.hbm [shape: bf16[3,128,128], index: 1, kind: input, shape index: {}]   ;;  %s1180_s2 = inlined_call_operand.hbm [shape: f32[48,128], index: 2, kind: output, shape index: {}]  }
   0x1   :  { %8 = vsyncpa [#allocation4], 0 }
   0x2   :  { %10 = vsyncpa [#allocation4 + $0x1], 0  ;;  %s1031_s9 = smov 0   ;;  %s1033_s10 = smov 0  }
   0x3   :  { %s1035_s11 = smov 0   ;;  %s1037_s12 = smov 0  }
   0x4 LB: > { %s1052_s13 = sadd.s32 4294967295, %s1003_s12   ;;  %s672_s14 = sadd.s32 4294967294, %s1003_s12   ;;  %s1003_s12 = sphi %s1037_s12, %s1198_s12   ;;  %s999_s11 = sphi %s1035_s11, %s1197_s11   ;;  %s995_s10 = sphi %s1033_s10, %s1196_s10   ;;  %s991_s9 = sphi %s1031_s9, %s1195_s9  }
   0x5   : > { %s1056_s15 = sadd.s32 1, %s1003_s12   ;;  %s70_s16 = sadd.s32 1, %s999_s11 }
   0x6   : > { %s67_s17 = ssub.s32 %s1003_s12, %s1056_s15  ;;  %p80_p0 = scmp.ne.s32.totalorder %s999_s11, %s995_s10 }
   0x7   : > { %p68_p1 = scmp.eq.s32.totalorder %s67_s17, 0  ;;  %p81_p2 = scmp.eq.s32.totalorder %s1052_s13, 1 }
   0x8   : > { %p86_p3 = scmp.ne.s32.totalorder %s995_s10, %s991_s9  ;;  %p87_p4 = scmp.eq.s32.totalorder %s672_s14, 1 }
   0x9   : > { %s1067_s18 = scalar_select %p68_p1, %s999_s11, %s70_s16  }
   0xa   : > { %p1069_p5 = por %p81_p2, %p80_p0  ;;  %p1073_p6 = por %p87_p4, %p86_p3 }
   0xb   : > { %p673_p7 = scmp.ge.s32.totalorder %s1003_s12, 1  ;;  %p94_p8 = scmp.lt.s32.totalorder %s1003_s12, 3 }
   0xc   : > { %s1184_s19 = scalar_select %p1069_p5, 1, 0 }
   0xd   : > { %s1185_s20 = scalar_select %p1073_p6, 1, 0 }
   0xe   : > { %p1181_p9 = scmp.eq.s32.totalorder %s1052_s13, 0  ;;  %p1080_p10 = pnand %p673_p7, %p94_p8 }
   0xf   : > { %s1005_s22 = smov [#allocation2]   ;;  %s909_s27 = scalar_lea.hbm %s1179_s1, 3072 }
  0x10   : > { %s1186_s21 = scalar_select %p1080_p10, 1, 0 }
  0x11   : > { %s106_s23 = sshll.u32 %s1005_s22, 4  ;;  %p826_p11 = pneg %p1080_p10  ;;  %s107_s23 = int_to_ptr.vmem [resolvable:$true] %s106_s23 }
  0x12   : > { %p910_p13 = scmp.ne.s32.totalorder %s1179_s1, %s909_s27  ;;  %p916_p3 = scmp.lt.u32.totalorder %s909_s27, %s1179_s1 }
  0x13   : > { %p1088_p12 = pnand %p1181_p9, %p826_p11 }
  0x15   : > { %p911_p0 = pneg %p1088_p12 }
  0x17   : > { %p912_p1 = pnand %p911_p0, %p910_p13 }
  0x19   : > { %p913_p2 = pneg %p912_p1 }
  0x1b   : > { %p918_p4 = pnand %p916_p3, %p913_p2 }
  0x1d   : > { %921 = shalt.err (!%p918_p4)
}
  0x1e   : > { %s922_s4 = scalar_lea.vmem %s107_s23, 3072  ;;  %p930_p9 = scmp.lt.s32.totalorder %s107_s23, %s107_s23 }
  0x1f   : > { %p923_p7 = scmp.ne.s32.totalorder %s107_s23, %s922_s4  ;;  %p931_p6 = scmp.lt.s32.totalorder %s922_s4, %s922_s4 }
  0x21   : > { %p925_p8 = pnand %p923_p7, %p911_p0  ;;  %p932_p5 = por %p931_p6, %p930_p9 }
  0x23   : > { %p926_p11 = pneg %p925_p8 }
  0x25   : > { %p933_p10 = pnand %p932_p5, %p926_p11 }
  0x27   : > { %936 = shalt.err (!%p933_p10)
}
  0x28   : > { %s1006_s5 = smov 64   ;;  %s1007_s6 = smov 4  }
  0x29   : > { %829 = dma.hbm_to_vmem [thread:$0]  (!%p1088_p12), %s1179_s1, 3072, %s107_s23, [#allocation3], %s1006_s5, %s1006_s5, %s1007_s6  }
  0x2a   : > { %p1188_p13 = scmp.ne.s32.totalorder %s1186_s21, 0 }
  0x2b   : > { %p1189_p1 = scmp.eq.s32.totalorder (!%p1188_p13), %s1052_s13, 0 }
  0x2c   : > { %131 = sbr.rel (%p1188_p13) target bundleno = 483 (0x1e3), region = 28 }
  0x33   : > { %982 = dma.done.wait (%p1189_p1), [#allocation3], 3072   ;;  %p1190_p0 = pmov %p1189_p1 }
  0x34   : > { %s153_s14 = smul.u32 3, %s1052_s13  ;;  %v1008_v0 = vmov 3   ;;  %v1009_v1 = vmov 2   ;;  %v885_v2 = vld [vmem:[#allocation2] sm:$0xff]   ;;  %v887_v9 = vld [vmem:[#allocation2 + $0x8] sm:$0xff]   ;;  %v889_v11 = vld [vmem:[#allocation2 + $0x10] sm:$0xff]   ;;  %v164_v38 = vlaneseq }
  0x35   : > { %984 = vsyncadd (%p1190_p0), [#allocation3], 4294964224  ;;  %879 = vset.pattern.permute.xlu0 %v1008_v0  ;;  %880 = vset.pattern.permute.xlu1 %v1009_v1  ;;  %v886_v8 = vld [vmem:[#allocation2 + $0x40] sm:$0xff]   ;;  %v888_v10 = vld [vmem:[#allocation2 + $0x48] sm:$0xff]   ;;  %v1010_v18 = vmov 1   ;;  %v1011_v24 = vmov 0  }
  0x36   : > { %p154_p5 = scmp.lt.s32.totalorder %s153_s14, 5  ;;  %772 = vmatprep.subr.bf16.mxu0 %v885_v2  ;;  %752 = vmatprep.subr.bf16.mxu1 %v886_v8  ;;  %v890_v13 = vld [vmem:[#allocation2 + $0x50] sm:$0xff]   ;;  %v891_v15 = vld [vmem:[#allocation2 + $0x18] sm:$0xff]   ;;  %v893_v20 = vld [vmem:[#allocation2 + $0x20] sm:$0xff]   ;;  %v165_v41 = vand.u32 127, %v164_v38  ;;  %s150_s23 = sand.u32 1, %s995_s10  }
  0x37   : > { %773 = vmatpush3.bf16.msra.mxu0 %v885_v2  ;;  %753 = vmatpush3.bf16.msra.mxu1 %v886_v8  ;;  %v892_v17 = vld [vmem:[#allocation2 + $0x58] sm:$0xff]   ;;  %v894_v22 = vld [vmem:[#allocation2 + $0x60] sm:$0xff]   ;;  %v895_v23 = vld [vmem:[#allocation2 + $0x28] sm:$0xff]   ;;  %v1012_v46 = vmov 1.0|1.0   ;;  %s819_s24 = smul.u32 24, %s150_s23 }
  0x38   : > { %s1200_s14 = smov (!%p154_p5, %s153_s14), 5  ;;  %774 = vmatprep.subr.bf16.mxu0 %v887_v9  ;;  %754 = vmatprep.subr.bf16.mxu1 %v888_v10  ;;  %v896_v25 = vld [vmem:[#allocation2 + $0x68] sm:$0xff]   ;;  %v897_v27 = vld [vmem:[#allocation2 + $0x30] sm:$0xff]   ;;  %v899_v30 = vld [vmem:[#allocation2 + $0x38] sm:$0xff]   ;;  %s721_s25 = smul.u32 384, %s1052_s13 }
  0x39   : > { %s678_s16 = sshll.u32 %s1200_s14, 3  ;;  %v898_v28 = vld [vmem:[#allocation2 + $0x70] sm:$0xff]   ;;  %v900_v31 = vld [vmem:[#allocation2 + $0x78] sm:$0xff]   ;;  %v901_v32 = vld [vmem:[#allocation2 + $0x80] sm:$0xff]   ;;  %s152_s26 = scalar_lea.vmem [#allocation5], %s819_s24 }
  0x3a   : > { %s157_s21 = scalar_lea.vmem %s1178_s0, %s678_s16  ;;  %v902_v48 = vld [vmem:[#allocation2 + $0x88] sm:$0xff]   ;;  %v903_v50 = vld [vmem:[#allocation2 + $0x90] sm:$0xff]   ;;  %v904_v51 = vld [vmem:[#allocation2 + $0x98] sm:$0xff]   ;;  %s598_s27 = sshll.u32 %s152_s26, 4  ;;  %s1130_s27 = int_to_ptr.vmem [resolvable:$true] %s598_s27 }
  0x3b   : > { %v161_v3 = vld [vmem:[%s157_s21] sm:$0xff]  ;;  %v162_v4 = vld [vmem:[%s157_s21 + $0x8] sm:$0xff]  ;;  %v163_v6 = vld [vmem:[%s157_s21 + $0x10] sm:$0xff]  ;;  %775 = vmatpush3.bf16.msra.mxu0 %v887_v9  ;;  %755 = vmatpush3.bf16.msra.mxu1 %v888_v10  ;;  %s1135_s30 = scalar_lea.hbm %s1180_s2, %s721_s25  ;;  %s1137_s13 = scalar_lea.sflag [#allocation4], %s150_s23 }
  0x3c   : > { %167 = vperm.xlu0 %879, %v161_v3   ;;  %v178_v5 = vadd.s32 24, %v161_v3  ;;  %v179_v7 = vadd.s32 24, %v162_v4  ;;  %v180_v12 = vadd.s32 24, %v163_v6  ;;  %v196_v14 = vadd.s32 31, %v161_v3  ;;  %776 = vmatprep.subr.bf16.mxu0 %v889_v11  ;;  %v905_v52 = vld [vmem:[#allocation2 + $0xa0] sm:$0xff]   ;;  %v906_v53 = vld [vmem:[#allocation2 + $0xa8] sm:$0xff]  }
  0x3d   : > { %v197_v16 = vadd.s32 31, %v162_v4  ;;  %756 = vmatprep.subr.bf16.mxu1 %v890_v13  ;;  %v214_v19 = vadd.s32 63, %v161_v3  ;;  %v198_v21 = vadd.s32 31, %v163_v6  ;;  %v215_v26 = vadd.s32 63, %v162_v4  ;;  %v907_v54 = vld [vmem:[#allocation2 + $0xb0] sm:$0xff]   ;;  %v908_v55 = vld [vmem:[#allocation2 + $0xb8] sm:$0xff]  }
  0x3e   : > { %182 = vperm.xlu1 %880, %v178_v5   ;;  %v216_v29 = vadd.s32 63, %v163_v6  ;;  %s937_s3 = scalar_lea.vmem %s1130_s27, 384  ;;  %p1193_p9 = scmp.ne.s32.totalorder %s1184_s19, 0 }
  0x3f   : > { %777 = vmatpush3.bf16.msra.mxu0 %v889_v11  ;;  %757 = vmatpush3.bf16.msra.mxu1 %v890_v13  ;;  %p938_p6 = scmp.ne.s32.totalorder %s1130_s27, %s937_s3  ;;  %s1013_s4 = smov [#allocation5]  }
  0x40   : > { %170 = vperm.xlu0 %879, %v162_v4   ;;  %778 = vmatprep.subr.bf16.mxu0 %v891_v15  ;;  %s941_s5 = sshll.u32 %s1013_s4, 4  ;;  %s942_s5 = int_to_ptr.vmem [resolvable:$false] %s941_s5 }
  0x41   : > { %758 = vmatprep.subr.bf16.mxu1 %v892_v17  ;;  %p939_p10 = pnand %p938_p6, %p1193_p9  ;;  %s943_s6 = scalar_lea.vmem %s942_s5, 768 }
  0x42   : > { %185 = vperm.xlu1 %880, %v179_v7   ;;  %p944_p2 = scmp.lt.s32.totalorder %s1130_s27, %s942_s5  ;;  %p945_p3 = scmp.lt.s32.totalorder %s943_s6, %s937_s3 }
  0x43   : > { %779 = vmatpush3.bf16.msra.mxu0 %v891_v15  ;;  %759 = vmatpush3.bf16.msra.mxu1 %v892_v17  ;;  %p940_p12 = pneg %p939_p10 }
  0x44   : > { %173 = vperm.xlu0 %879, %v163_v6   ;;  %780 = vmatprep.subr.bf16.mxu0 %v893_v20  ;;  %p946_p4 = por %p945_p3, %p944_p2 }
  0x45   : > { %760 = vmatprep.subr.bf16.mxu1 %v894_v22 }
  0x46   : > { %188 = vperm.xlu1 %880, %v180_v12   ;;  %p947_p7 = pnand %p946_p4, %p940_p12 }
  0x47   : > { %781 = vmatpush3.bf16.msra.mxu0 %v893_v20  ;;  %761 = vmatpush3.bf16.msra.mxu1 %v894_v22 }
  0x48   : > { %881 = vset.pattern.permute.xlu0 %v1010_v18  ;;  %782 = vmatprep.subr.bf16.mxu0 %v895_v23 }
  0x49   : > { %200 = vperm.xlu0 %881, %v196_v14   ;;  %762 = vmatprep.subr.bf16.mxu1 %v896_v25 }
  0x4a   : > { %882 = vset.pattern.permute.xlu1 %v1010_v18 }
  0x4b   : > { %203 = vperm.xlu1 %882, %v197_v16   ;;  %783 = vmatpush3.bf16.msra.mxu0 %v895_v23 }
  0x4c   : > { %784 = vmatprep.subr.bf16.mxu0 %v897_v27  ;;  %763 = vmatpush3.bf16.msra.mxu1 %v896_v25 }
  0x4d   : > { %883 = vset.pattern.permute.xlu0 %v1011_v24  ;;  %764 = vmatprep.subr.bf16.mxu1 %v898_v28 }
  0x4e   : > { %218 = vperm.xlu0 %883, %v214_v19  }
  0x4f   : > { %206 = vperm.xlu1 %882, %v198_v21   ;;  %785 = vmatpush3.bf16.msra.mxu0 %v897_v27 }
  0x50   : > { %786 = vmatprep.subr.bf16.mxu0 %v899_v30  ;;  %765 = vmatpush3.bf16.msra.mxu1 %v898_v28 }
  0x51   : > { %766 = vmatprep.subr.bf16.mxu1 %v900_v31 }
  0x53   : > { %884 = vset.pattern.permute.xlu1 %v1011_v24  ;;  %787 = vmatpush3.bf16.msra.mxu0 %v899_v30 }
  0x54   : > { %221 = vperm.xlu1 %884, %v215_v26   ;;  %792 = vmatprep.subr.bf16.mxu0 %v901_v32 }
  0x55   : > { %767 = vmatpush3.bf16.msra.mxu1 %v900_v31 }
  0x58   : > { %224 = vperm.xlu1 %884, %v216_v29  }
  0xbb   : > { %v168_v33 = vpop.permute.xlu0 %167 }
  0xbc   : > { %vm175_vm0 = vcmp.eq.s32.totalorder %v165_v41, %v168_v33 }
  0xbd   : > { %v183_v34 = vpop.permute.xlu1 %182 }
  0xbe   : > { %vm190_vm1 = vcmp.eq.s32.totalorder %v165_v41, %v183_v34 }
  0xbf   : > { %v171_v35 = vpop.permute.xlu0 %170  ;;  %vm193_vm5 = vmor %vm175_vm0, %vm190_vm1 }
  0xc0   : > { %vm176_vm2 = vcmp.eq.s32.totalorder %v165_v41, %v171_v35 }
  0xc1   : > { %v186_v36 = vpop.permute.xlu1 %185 }
  0xc2   : > { %vm191_vm3 = vcmp.eq.s32.totalorder %v165_v41, %v186_v36 }
  0xc3   : > { %v174_v37 = vpop.permute.xlu0 %173  ;;  %vm194_vm7 = vmor %vm176_vm2, %vm191_vm3 }
  0xc4   : > { %vm177_vm11 = vcmp.eq.s32.totalorder %v165_v41, %v174_v37 }
  0xc5   : > { %v189_v39 = vpop.permute.xlu1 %188 }
  0xc6   : > { %vm192_vm12 = vcmp.eq.s32.totalorder %v165_v41, %v189_v39 }
  0xc7   : > { %vm195_vm2 = vmor %vm177_vm11, %vm192_vm12 }
  0xc8   : > { %v201_v40 = vpop.permute.xlu0 %200 }
  0xc9   : > { %vm208_vm4 = vcmp.eq.s32.totalorder %v165_v41, %v201_v40 }
  0xca   : > { %v204_v42 = vpop.permute.xlu1 %203  ;;  %vm211_vm9 = vmor %vm193_vm5, %vm208_vm4 }
  0xcb   : > { %vm209_vm6 = vcmp.eq.s32.totalorder %v165_v41, %v204_v42 }
  0xcc   : > { %vm212_vm10 = vmor %vm194_vm7, %vm209_vm6 }
  0xcd   : > { %v219_v43 = vpop.permute.xlu0 %218 }
  0xce   : > { %v207_v44 = vpop.permute.xlu1 %206  ;;  %vm226_vm8 = vcmp.eq.s32.totalorder %v165_v41, %v219_v43 }
  0xcf   : > { %vm229_vm13 = vmor %vm211_vm9, %vm226_vm8  ;;  %vm210_vm15 = vcmp.eq.s32.totalorder %v165_v41, %v207_v44 }
  0xd0   : > { %vm213_vm3 = vmor %vm195_vm2, %vm210_vm15 }
  0xd3   : > { %v222_v45 = vpop.permute.xlu1 %221 }
  0xd4   : > { %vm227_vm14 = vcmp.eq.s32.totalorder %v165_v41, %v222_v45 }
  0xd5   : > { %vm230_vm0 = vmor %vm212_vm10, %vm227_vm14 }
  0xd6   : > { %vm690_vm1 = vmpackc.low %vm230_vm0, %vm229_vm13 }
  0xd7   : > { %768 = vmatprep.mubr.msk.bf16.mxu1 %vm690_vm1, %v1012_v46  ;;  %788 = vmatprep.mubr.msk.bf16.mxu0 %vm690_vm1, %v1012_v46  ;;  %v225_v47 = vpop.permute.xlu1 %224 }
  0xd8   : > { %vm228_vm4 = vcmp.eq.s32.totalorder %v165_v41, %v225_v47 }
  0xd9   : > { %vm231_vm5 = vmor %vm213_vm3, %vm228_vm4 }
  0xda   : > { %vm1118_vm6 = vmpackc.low %vm231_vm5, %vm231_vm5 }
  0xdb   : > { %769 = vmatmul.mubr.msk.bf16.vlgmr.msra.gmra.mrb[0].mxu1 %vm1118_vm6, %v1012_v46  ;;  %789 = vmatmul.mubr.msk.bf16.vlgmr.msra.gmra.mrb[0].mxu0 %vm1118_vm6, %v1012_v46 }
  0xdc   : > { %793 = vmatpush3.bf16.msra.mxu0 %v901_v32  ;;  %808 = vmatprep.mubr.msk.bf16.mxu0 %vm690_vm1, %v1012_v46 }
  0xdd   : > { %794 = vmatprep.subr.bf16.mxu0 %v902_v48 }
  0xe0   : > { %795 = vmatpush3.bf16.msra.mxu0 %v902_v48 }
  0xe1   : > { %796 = vmatprep.subr.bf16.mxu0 %v903_v50 }
  0xe4   : > { %797 = vmatpush3.bf16.msra.mxu0 %v903_v50 }
  0xe5   : > { %798 = vmatprep.subr.bf16.mxu0 %v904_v51 }
  0xe8   : > { %799 = vmatpush3.bf16.msra.mxu0 %v904_v51 }
  0xe9   : > { %800 = vmatprep.subr.bf16.mxu0 %v905_v52 }
  0xec   : > { %801 = vmatpush3.bf16.msra.mxu0 %v905_v52 }
  0xed   : > { %802 = vmatprep.subr.bf16.mxu0 %v906_v53 }
  0xf0   : > { %803 = vmatpush3.bf16.msra.mxu0 %v906_v53 }
  0xf1   : > { %804 = vmatprep.subr.bf16.mxu0 %v907_v54 }
  0xf4   : > { %805 = vmatpush3.bf16.msra.mxu0 %v907_v54 }
  0xf5   : > { %806 = vmatprep.subr.bf16.mxu0 %v908_v55 }
  0xf8   : > { %807 = vmatpush3.bf16.msra.mxu0 %v908_v55 }
  0xfb   : > { %809 = vmatmul.mubr.msk.bf16.vlgmr.msra.gmra.mrb[0].mxu0 %vm1118_vm6, %v1012_v46 }
 0x1ae   : > { %v770_v56 = vpop.f32.mrb[0].mxu1 }
 0x1af   : > { %v355_v57 = vpop.f32.mrb[1].mxu1 }
 0x1b0   : > { %v771_v58 = vpop.f32.mrb[2].mxu1 }
 0x1b1   : > { %v358_v59 = vpop.f32.mrb[3].mxu1 }
 0x1ce   : > { %v810_v60 = vpop.f32.mrb[0].mxu0 }
 0x1cf   : > { %v812_v61 = vadd.f32 %v810_v60, %v770_v56  ;;  %v564_v62 = vpop.f32.mrb[1].mxu0 }
 0x1d0   : > { %v813_v63 = vadd.f32 %v564_v62, %v355_v57  ;;  %v811_v0 = vpop.f32.mrb[2].mxu0 }
 0x1d1   : > { %583 = vst [vmem:[%s152_s26 + $0x10] sm:$0xff] %v812_v61  ;;  %v567_v1 = vpop.f32.mrb[3].mxu0 }
 0x1d2   : > { %581 = vst [vmem:[%s152_s26] sm:$0xff] %v813_v63  ;;  %v814_v2 = vadd.f32 %v567_v1, %v358_v59 }
 0x1d4   : > { %582 = vst [vmem:[%s152_s26 + $0x8] sm:$0xff] %v814_v2 }
 0x1d5   : > { %950 = shalt.err (!%p947_p7)
}
 0x1d6   : > { %s951_s7 = scalar_lea.hbm %s1135_s30, 384  ;;  %s955_s16 = scalar_lea.hbm %s1180_s2, 768 }
 0x1d7   : > { %p952_p8 = scmp.ne.s32.totalorder %s1135_s30, %s951_s7  ;;  %p956_p1 = scmp.lt.u32.totalorder %s1135_s30, %s1180_s2 }
 0x1d8   : > { %p957_p0 = scmp.lt.u32.totalorder %s955_s16, %s951_s7  ;;  %p959_p6 = scmp.lt.u32.totalorder %s951_s7, %s1135_s30 }
 0x1d9   : > { %p953_p11 = pnand %p952_p8, %p1193_p9 }
 0x1da   : > { %p958_p5 = por %p957_p0, %p956_p1 }
 0x1db   : > { %p954_p13 = pneg %p953_p11 }
 0x1dc   : > { %p960_p10 = por %p959_p6, %p958_p5 }
 0x1de   : > { %p961_p12 = pnand %p960_p10, %p954_p13 }
 0x1e0   : > { %964 = shalt.err (!%p961_p12)
}
 0x1e1   : > { %s1014_s21 = smov 128   ;;  %s1015_s23 = smov 8  }
 0x1e2   : > { %824 = dma.vmem_to_hbm [thread:$0]  (%p1193_p9), %s1130_s27, 384, %s1135_s30, %s1137_s13, %s1014_s21, %s1014_s21, %s1015_s23  }
 0x1e3 PF: > { %p836_p2 = scmp.ge.s32.totalorder %s1003_s12, 2  ;;  %s613_s24 = sand.u32 1, %s991_s9  }
 0x1e4   : > { %p1194_p3 = scmp.ne.s32.totalorder %s1185_s20, 0  ;;  %s614_s25 = scalar_lea.sflag [#allocation4], %s613_s24 }
 0x1e6   : > { %p831_p4 = pnand %p836_p2, %p1194_p3 }
 0x1e8   : > { %986 = dma.done.wait (!%p831_p4), %s614_s25, 384  }
 0x1e9   : > { %988 = vsyncadd (!%p831_p4), %s614_s25, 4294966912  ;;  %p13_p7 = scmp.ge.s32.totalorder %s1056_s15, 4   ;;  %s1195_s9 = smov %s995_s10 }
 0x1ea   : > { %s1196_s10 = smov %s999_s11  ;;  %s1197_s11 = smov %s1067_s18 }
 0x1eb   : > { %s1198_s12 = smov %s1056_s15  ;;  %15 = sbr.rel (!%p13_p7) target bundleno = 4 (0x4), region = 70 }
 0x1f2   :  { %619 = vsyncpa [#allocation3], 1 }
 0x1f3   :  { %621 = vsyncpa [#allocation3 + $0x1], 1 }
 0x1f4   :  { %622 = vsyncpa [#allocation4], 1 }
 0x1f5   :  { %624 = vsyncpa [#allocation4 + $0x1], 1 }

</bundles_post_ra>
